<compile_context>
chip_gen: v7x
topology: tpu7x:2x2x1
jax: 0.10.0
libtpu: 0.0.40
codegen_flags: <defaults>
</compile_context>

<pallas_src>
import functools

import jax
import jax.numpy as jnp
from jax.experimental import pallas as pl
from jax.experimental.pallas import tpu as pltpu


def _round_up(n, m):
    return ((n + m - 1) // m) * m


def _vmem_capacity_bytes():
    try:
        return int(pltpu.get_tpu_info().vmem_capacity_bytes)
    except Exception:
        return 128 * 1024 * 1024


def _has_bf16_vpu():
    # v6e and later have a bf16 VALU; v5e/v5p/v4 and older do not.
    try:
        kind = jax.devices()[0].device_kind.lower()
    except Exception:
        return False
    return not any(old in kind for old in ("v2", "v3", "v4", "v5"))


def _gdiff_kernel(*refs, W, L_valid, has_jj, compute_dtype):
    """Partial gradient-difference sum for one block of flattened planes.

    x_ref / y_ref: (P, Lp) with Lp = round_up(H*W, 128); each sublane row is one (H, W)
      plane flattened row-major (lanes >= L_valid are padding, masked out of the sum),
      so +-1 (horizontal) and +-W (vertical) neighbours are lane rotations.
    jj_ref (only when W is not a power of two): (1, Lp) int32, column index j = c % W.
    out_ref: (1, 1) SMEM f32, this block's partial sum.
    """
    if has_jj:
        jj_ref, x_ref, y_ref, out_ref = refs
    else:
        x_ref, y_ref, out_ref = refs

    P, Lp = x_ref.shape
    x = x_ref[...].astype(compute_dtype)
    y = y_ref[...].astype(compute_dtype)

    col = jax.lax.broadcasted_iota(jnp.int32, (1, Lp), 1)     # flattened index c
    jj = jj_ref[...] if has_jj else (col & (W - 1))           # column-in-image index

    # Hoist the replicate-pad edge masks and broadcast them to (P, Lp) ONCE
    # (JAX does not CSE broadcast_in_dim; each jnp.where would otherwise re-broadcast).
    is_left = jnp.broadcast_to(jj == 0, (P, Lp))
    is_right = jnp.broadcast_to(jj == W - 1, (P, Lp))
    is_top = jnp.broadcast_to(col < W, (P, Lp))
    is_bot = jnp.broadcast_to(col >= L_valid - W, (P, Lp))

    def central_diff(a, step, lo_mask, hi_mask):
        # a[c + step] - a[c - step] along the flattened plane with replicate padding.
        # pltpu.roll only takes non-negative shifts, so "-step" is "Lp - step".
        nxt = jnp.where(hi_mask, a, pltpu.roll(a, shift=(Lp - step) % Lp, axis=1))
        prv = jnp.where(lo_mask, a, pltpu.roll(a, shift=step % Lp, axis=1))
        return nxt - prv

    # Vertical gradient (grad_u) fully computed & accumulated before the horizontal one,
    # so its roll/select temporaries are dead before grad_v's are created.
    d = jnp.abs(jnp.abs(central_diff(x, W, is_top, is_bot))
                - jnp.abs(central_diff(y, W, is_top, is_bot)))
    d = d + jnp.abs(jnp.abs(central_diff(x, 1, is_left, is_right))
                    - jnp.abs(central_diff(y, 1, is_left, is_right)))

    if Lp != L_valid:
        # Lane-padding validity mask (pad lanes pick up garbage from the roll wrap).
        d = jnp.where(col < L_valid, d, jnp.zeros((), d.dtype))

    # Single reduction; always accumulate in f32 even when the pipeline ran in bf16.
    out_ref[0, 0] = 0.5 * jnp.sum(d.astype(jnp.float32))


def gradient_difference_2d(x, y, reduction="mean"):
    """JAX/Pallas forward of GradientDifference2d (grad_method='default', gauss_sigma=None)."""
    if x.ndim != 4 or y.ndim != 4:
        raise ValueError("expected 4D input (got {}D / {}D)".format(x.ndim, y.ndim))
    if x.shape[1] != y.shape[1]:
        # channel-mismatch branch of the torch module: mean over channels first
        x = jnp.mean(x, axis=1, keepdims=True)
        y = jnp.mean(y, axis=1, keepdims=True)
    if x.shape != y.shape:
        raise ValueError("shape mismatch: {} vs {}".format(x.shape, y.shape))
    B, C, H, W = x.shape
    BC, L = B * C, H * W
    Lp = _round_up(L, 128)   # keep every vector op lane-dense / unmasked

    # Flatten each (H, W) plane into one lane-dense row (contiguous reshape, no copy).
    # Native dtypes pass straight through the DMA; any widening happens in-kernel.
    xf = x.reshape(BC, L)
    yf = y.reshape(BC, L)
    if Lp != L:
        xf = jnp.pad(xf, ((0, 0), (0, Lp - L)))
        yf = jnp.pad(yf, ((0, 0), (0, Lp - L)))

    x_item = jnp.dtype(xf.dtype).itemsize
    y_item = jnp.dtype(yf.dtype).itemsize
    # Sublane alignment required by the narrowest input dtype (f32: 8, bf16: 16, int8: 32).
    align = max(8, 32 // x_item, 32 // y_item)

    compute_dtype = (jnp.bfloat16
                     if (xf.dtype == jnp.bfloat16 and yf.dtype == jnp.bfloat16
                         and _has_bf16_vpu())
                     else jnp.float32)
    c_item = jnp.dtype(compute_dtype).itemsize
    dma_item = min(x_item, y_item)

    # Generation-aware block / VMEM budgets.
    vmem_cap = _vmem_capacity_bytes()
    if vmem_cap <= 64 * 1024 * 1024:          # v7x-class: small VMEM, huge HBM BW
        target_dma_bytes = 3 << 19            # ~1.5 MiB DMA per input per step
        vmem_limit = 48 << 20
    else:                                     # v5e / v6e: 128 MiB physical VMEM
        target_dma_bytes = 3 << 20            # ~3 MiB DMA per input per step
        vmem_limit = 80 << 20

    plane_dma_bytes = Lp * dma_item
    plane_tmp_bytes = Lp * c_item * 12        # ~live (P,Lp) temporaries per plane, worst case
    p_dma = max(1, target_dma_bytes // plane_dma_bytes)            # DMA-size target
    p_tmp = max(1, (vmem_limit // 2) // plane_tmp_bytes)           # in-kernel temp budget
    min_steps = 8                              # enough steps for pipelining + 2 v7x TCs
    p_steps = _round_up(pl.cdiv(BC, min_steps), align)             # keep the grid populated
    p = min(p_dma, p_tmp, p_steps)
    p = max(align, (p // align) * align)

    # If even the minimum block needs more scoped VMEM than the default budget, raise it
    # (bounded well below physical capacity).
    step_bytes = 4 * p * Lp * dma_item + p * plane_tmp_bytes
    vmem_limit = max(vmem_limit, min(vmem_cap * 3 // 4, step_bytes + (4 << 20)))

    bc_pad = _round_up(BC, p)
    if bc_pad != BC:  # zero planes contribute zero gradient difference
        xf = jnp.pad(xf, ((0, bc_pad - BC), (0, 0)))
        yf = jnp.pad(yf, ((0, bc_pad - BC), (0, 0)))
    num_blocks = bc_pad // p

    pow2_W = (W & (W - 1)) == 0
    kernel = functools.partial(_gdiff_kernel, W=W, L_valid=L,
                               has_jj=not pow2_W, compute_dtype=compute_dtype)

    in_specs = []
    args = []
    if not pow2_W:
        # Column-in-image indices precomputed on the host (tiny int32 row) so the kernel
        # needs no vector integer div/mod; dropped entirely when W is a power of two.
        jj = (jnp.arange(Lp, dtype=jnp.int32) % W).reshape(1, Lp)
        in_specs.append(pl.BlockSpec((1, Lp), lambda i: (0, 0)))
        args.append(jj)
    in_specs += [
        pl.BlockSpec((p, Lp), lambda i: (i, 0)),   # x planes
        pl.BlockSpec((p, Lp), lambda i: (i, 0)),   # y planes
    ]
    args += [xf, yf]

    partials = pl.pallas_call(
        kernel,
        out_shape=jax.ShapeDtypeStruct((num_blocks, 1), jnp.float32),
        grid_spec=pltpu.PrefetchScalarGridSpec(
            num_scalar_prefetch=0,
            grid=(num_blocks,),
            in_specs=in_specs,
            # One partial sum per block -> no cross-step accumulator, grid can be 'parallel'.
            out_specs=pl.BlockSpec((1, 1), lambda i: (i, 0), memory_space=pltpu.SMEM),
        ),
        compiler_params=pltpu.CompilerParams(
            dimension_semantics=("parallel",),
            vmem_limit_bytes=int(vmem_limit),
        ),
    )(*args)

    total = jnp.sum(partials)
    if reduction == "mean":
        return total / jnp.float32(BC * H * W)
    elif reduction == "sum":
        return total
    else:
        raise KeyError("unsupported reduction type: %s" % reduction)


def _reference(x, y):
    """Pure-JAX reference mirroring the PyTorch module (default config)."""
    if x.shape[1] != y.shape[1]:
        x = jnp.mean(x, axis=1, keepdims=True)
        y = jnp.mean(y, axis=1, keepdims=True)

    def gu(a):
        ap = jnp.pad(a, ((0, 0), (0, 0), (1, 1), (1, 1)), mode="edge")
        return ap[:, :, 2:, 1:-1] - ap[:, :, :-2, 1:-1]

    def gv(a):
        ap = jnp.pad(a, ((0, 0), (0, 0), (1, 1), (1, 1)), mode="edge")
        return ap[:, :, 1:-1, 2:] - ap[:, :, 1:-1, :-2]

    du = jnp.abs(jnp.abs(gu(x)) - jnp.abs(gu(y)))
    dv = jnp.abs(jnp.abs(gv(x)) - jnp.abs(gv(y)))
    return jnp.mean(0.5 * (du + dv))


if __name__ == "__main__":
    key = jax.random.PRNGKey(0)
    kx, ky = jax.random.split(key)
    B, C, H, W = 2, 4, 16, 16
    x = jax.random.normal(kx, (B, C, H, W), dtype=jnp.float32)
    y = jax.random.normal(ky, (B, C, H, W), dtype=jnp.float32)

    out = jax.block_until_ready(gradient_difference_2d(x, y))
    ref = jax.block_until_ready(_reference(x, y))
    assert jnp.allclose(out, ref, rtol=1e-5, atol=1e-5), (out, ref)

    print("KERNEL_OK")
</pallas_src>

<mosaic_0001>
module attributes {stable_mosaic.version = 11 : i64} {
  func.func @_gdiff_kernel(%arg0: i32, %arg1: memref<8x256xf32, #tpu.memory_space<vmem>>, %arg2: memref<8x256xf32, #tpu.memory_space<vmem>>, %arg3: memref<1x1xf32, #tpu.memory_space<smem>>) attributes {dimension_semantics = [#tpu.dimension_semantics<parallel>], iteration_bounds = array<i64: 1>, scalar_prefetch = 0 : i64, scratch_operands = 0 : i64, tpu.core_type = #tpu.core_type<tc>, window_params = [{transform_indices = @transform_0, window_bounds = array<i64: 8, 256>}, {transform_indices = @transform_1, window_bounds = array<i64: 8, 256>}, {transform_indices = @transform_2, window_bounds = array<i64: 1, 1>}]} {
    %c0 = arith.constant 0 : index
    %c0_0 = arith.constant 0 : index
    %0 = vector.load %arg1[%c0, %c0_0] : memref<8x256xf32, #tpu.memory_space<vmem>>, vector<8x256xf32>
    %c0_1 = arith.constant 0 : index
    %c0_2 = arith.constant 0 : index
    %1 = vector.load %arg2[%c0_1, %c0_2] : memref<8x256xf32, #tpu.memory_space<vmem>>, vector<8x256xf32>
    %2 = tpu.iota {dimensions = array<i32: 1>} : vector<1x256xi32>
    %c15_i32 = arith.constant 15 : i32
    %3 = vector.broadcast %c15_i32 : i32 to vector<1x256xi32>
    %4 = arith.andi %2, %3 : vector<1x256xi32>
    %c0_i32 = arith.constant 0 : i32
    %5 = vector.broadcast %c0_i32 : i32 to vector<1x256xi32>
    %6 = arith.cmpi eq, %4, %5 : vector<1x256xi32>
    %7 = vector.shape_cast %6 : vector<1x256xi1> to vector<1x256xi1>
    %8 = vector.broadcast %7 : vector<1x256xi1> to vector<8x256xi1>
    %c15_i32_3 = arith.constant 15 : i32
    %9 = vector.broadcast %c15_i32_3 : i32 to vector<1x256xi32>
    %10 = arith.cmpi eq, %4, %9 : vector<1x256xi32>
    %11 = vector.shape_cast %10 : vector<1x256xi1> to vector<1x256xi1>
    %12 = vector.broadcast %11 : vector<1x256xi1> to vector<8x256xi1>
    %c16_i32 = arith.constant 16 : i32
    %13 = vector.broadcast %c16_i32 : i32 to vector<1x256xi32>
    %14 = arith.cmpi slt, %2, %13 : vector<1x256xi32>
    %15 = vector.shape_cast %14 : vector<1x256xi1> to vector<1x256xi1>
    %16 = vector.broadcast %15 : vector<1x256xi1> to vector<8x256xi1>
    %c240_i32 = arith.constant 240 : i32
    %17 = vector.broadcast %c240_i32 : i32 to vector<1x256xi32>
    %18 = arith.cmpi sge, %2, %17 : vector<1x256xi32>
    %19 = vector.shape_cast %18 : vector<1x256xi1> to vector<1x256xi1>
    %20 = vector.broadcast %19 : vector<1x256xi1> to vector<8x256xi1>
    %c240_i32_4 = arith.constant 240 : i32
    %21 = tpu.dynamic_rotate %0 by %c240_i32_4 dim 1 : vector<8x256xf32>, i32 -> vector<8x256xf32>
    %22 = arith.select %20, %0, %21 : vector<8x256xi1>, vector<8x256xf32>
    %c16_i32_5 = arith.constant 16 : i32
    %23 = tpu.dynamic_rotate %0 by %c16_i32_5 dim 1 : vector<8x256xf32>, i32 -> vector<8x256xf32>
    %24 = arith.select %16, %0, %23 : vector<8x256xi1>, vector<8x256xf32>
    %25 = arith.subf %22, %24 : vector<8x256xf32>
    %26 = math.absf %25 : vector<8x256xf32>
    %c240_i32_6 = arith.constant 240 : i32
    %27 = tpu.dynamic_rotate %1 by %c240_i32_6 dim 1 : vector<8x256xf32>, i32 -> vector<8x256xf32>
    %28 = arith.select %20, %1, %27 : vector<8x256xi1>, vector<8x256xf32>
    %c16_i32_7 = arith.constant 16 : i32
    %29 = tpu.dynamic_rotate %1 by %c16_i32_7 dim 1 : vector<8x256xf32>, i32 -> vector<8x256xf32>
    %30 = arith.select %16, %1, %29 : vector<8x256xi1>, vector<8x256xf32>
    %31 = arith.subf %28, %30 : vector<8x256xf32>
    %32 = math.absf %31 : vector<8x256xf32>
    %33 = arith.subf %26, %32 : vector<8x256xf32>
    %34 = math.absf %33 : vector<8x256xf32>
    %c255_i32 = arith.constant 255 : i32
    %35 = tpu.dynamic_rotate %0 by %c255_i32 dim 1 : vector<8x256xf32>, i32 -> vector<8x256xf32>
    %36 = arith.select %12, %0, %35 : vector<8x256xi1>, vector<8x256xf32>
    %c1_i32 = arith.constant 1 : i32
    %37 = tpu.dynamic_rotate %0 by %c1_i32 dim 1 : vector<8x256xf32>, i32 -> vector<8x256xf32>
    %38 = arith.select %8, %0, %37 : vector<8x256xi1>, vector<8x256xf32>
    %39 = arith.subf %36, %38 : vector<8x256xf32>
    %40 = math.absf %39 : vector<8x256xf32>
    %c255_i32_8 = arith.constant 255 : i32
    %41 = tpu.dynamic_rotate %1 by %c255_i32_8 dim 1 : vector<8x256xf32>, i32 -> vector<8x256xf32>
    %42 = arith.select %12, %1, %41 : vector<8x256xi1>, vector<8x256xf32>
    %c1_i32_9 = arith.constant 1 : i32
    %43 = tpu.dynamic_rotate %1 by %c1_i32_9 dim 1 : vector<8x256xf32>, i32 -> vector<8x256xf32>
    %44 = arith.select %8, %1, %43 : vector<8x256xi1>, vector<8x256xf32>
    %45 = arith.subf %42, %44 : vector<8x256xf32>
    %46 = math.absf %45 : vector<8x256xf32>
    %47 = arith.subf %40, %46 : vector<8x256xf32>
    %48 = math.absf %47 : vector<8x256xf32>
    %49 = arith.addf %34, %48 : vector<8x256xf32>
    %50 = vector.shape_cast %49 : vector<8x256xf32> to vector<1x8x256xf32>
    %cst = arith.constant dense<0.000000e+00> : vector<1xf32>
    %51 = vector.multi_reduction <add>, %50, %cst [1, 2] : vector<1x8x256xf32> to vector<1xf32>
    %52 = vector.shape_cast %51 : vector<1xf32> to vector<1x1x1xf32>
    %53 = vector.extract %52[0, 0, 0] : f32 from vector<1x1x1xf32>
    %cst_10 = arith.constant 5.000000e-01 : f32
    %54 = arith.mulf %cst_10, %53 : f32
    %c0_11 = arith.constant 0 : index
    %c0_12 = arith.constant 0 : index
    %55 = memref.load %arg3[%c0_11, %c0_12] : memref<1x1xf32, #tpu.memory_space<smem>>
    memref.store %54, %arg3[%c0_11, %c0_12] : memref<1x1xf32, #tpu.memory_space<smem>>
    return
  }
  func.func @transform_0(%arg0: i32) -> (i32, i32) {
    %c0_i32 = arith.constant 0 : i32
    %c0_i32_0 = arith.constant 0 : i32
    return %arg0, %c0_i32 : i32, i32
  }
  func.func @transform_1(%arg0: i32) -> (i32, i32) {
    %c0_i32 = arith.constant 0 : i32
    %c0_i32_0 = arith.constant 0 : i32
    return %arg0, %c0_i32 : i32, i32
  }
  func.func @transform_2(%arg0: i32) -> (i32, i32) {
    %c0_i32 = arith.constant 0 : i32
    %c0_i32_0 = arith.constant 0 : i32
    return %arg0, %c0_i32 : i32, i32
  }
}

</mosaic_0001>

<bundles_post_ra>
// kernel: tpu_custom_call.1
= control target key start
LH: loop header
LB: loop body
LE: loop exit
PB: predicated region body
PF: predicated region fallthrough
CT: control target
= control target key end

     0   :  { %7 = vsyncpa [#allocation3], 0  ;;  %s405_s0 = inlined_call_operand.hbm [shape: f32[8,256], index: 0, kind: input, shape index: {}]   ;;  %s406_s1 = inlined_call_operand.hbm [shape: f32[8,256], index: 1, kind: input, shape index: {}]   ;;  %s407_s2 = inlined_call_operand.hbm [shape: f32[1,1], index: 2, kind: output, shape index: {}]  }
   0x1   :  { %8 = vsyncpa [#allocation6], 0 }
   0x2   :  { %9 = vsyncpa [#allocation4], 0  ;;  %s259_s9 = smov [#allocation2]   ;;  %s260_s11 = smov [#allocation5]  }
   0x3   :  { %s16_s10 = sshll.u32 %s259_s9, 4  ;;  %s26_s12 = sshll.u32 %s260_s11, 4  ;;  %s17_s10 = int_to_ptr.vmem [resolvable:$true] %s16_s10  ;;  %s27_s12 = int_to_ptr.vmem [resolvable:$true] %s26_s12 }
   0x4   :  { %s199_s15 = scalar_lea.hbm %s405_s0, 256 }
   0x5   :  { %p200_p0 = scmp.ne.s32.totalorder %s405_s0, %s199_s15  ;;  %p203_p1 = scmp.lt.u32.totalorder %s199_s15, %s405_s0 }
   0x7   :  { %p205_p2 = pnand %p203_p1, %p200_p0 }
   0x9   :  { %208 = shalt.err (!%p205_p2)
}
   0xa   :  { %s209_s20 = scalar_lea.vmem %s17_s10, 256  ;;  %p214_p4 = scmp.lt.s32.totalorder %s17_s10, %s17_s10 }
   0xb   :  { %p210_p3 = scmp.ne.s32.totalorder %s17_s10, %s209_s20  ;;  %p215_p5 = scmp.lt.s32.totalorder %s209_s20, %s209_s20 }
   0xd   :  { %p216_p6 = por %p215_p5, %p214_p4 }
   0xf   :  { %p217_p7 = pnand %p216_p6, %p210_p3 }
  0x11   :  { %220 = shalt.err (!%p217_p7)
}
  0x12   :  { %19 = dma.hbm_to_vmem [thread:$0]  %s405_s0, 256, %s17_s10, [#allocation3]  }
  0x13   :  { %s221_s25 = scalar_lea.hbm %s406_s1, 256 }
  0x14   :  { %p222_p8 = scmp.ne.s32.totalorder %s406_s1, %s221_s25  ;;  %p225_p9 = scmp.lt.u32.totalorder %s221_s25, %s406_s1 }
  0x16   :  { %p227_p10 = pnand %p225_p9, %p222_p8 }
  0x18   :  { %230 = shalt.err (!%p227_p10)
}
  0x19   :  { %s231_s30 = scalar_lea.vmem %s27_s12, 256  ;;  %p236_p12 = scmp.lt.s32.totalorder %s27_s12, %s27_s12 }
  0x1a   :  { %p232_p11 = scmp.ne.s32.totalorder %s27_s12, %s231_s30  ;;  %p237_p13 = scmp.lt.s32.totalorder %s231_s30, %s231_s30 }
  0x1c   :  { %p238_p0 = por %p237_p13, %p236_p12 }
  0x1e   :  { %p239_p1 = pnand %p238_p0, %p232_p11 }
  0x20   :  { %242 = shalt.err (!%p239_p1)
}
  0x21   :  { %29 = dma.hbm_to_vmem [thread:$0]  %s406_s1, 256, %s27_s12, [#allocation6]  }
  0x22   :  { %253 = dma.done.wait [#allocation3], 256  }
  0x23   :  { %254 = vsyncadd [#allocation3], 4294967040 }
  0x24   :  { %255 = dma.done.wait [#allocation6], 256  }
  0x25   :  { %256 = vsyncadd [#allocation6], 4294967040  ;;  %v305_v0 = vld [vmem:[#allocation2] sm:$0xff]  ;;  %s261_s4 = smov 16   ;;  %s262_s5 = smov 112   ;;  %v309_v1 = vld [vmem:[#allocation2 + $0x8] sm:$0xff]  ;;  %v40_v8 = vlaneseq }
  0x26   :  { %78 = vrot.lane.b32.xlu1 %v305_v0, %s261_s4  ;;  %69 = vrot.lane.b32.xlu0 %v305_v0, %s262_s5  ;;  %v313_v2 = vld [vmem:[#allocation5 + $0x8] sm:$0xff]  ;;  %v315_v3 = vld [vmem:[#allocation5] sm:$0xff]  ;;  %s263_s1 = smov 127   ;;  %s264_s6 = smov 1  }
  0x27   :  { %v41_v11 = vand.u32 127, %v40_v8  ;;  %s243_s11 = scalar_lea.hbm %s407_s2, 16 }
  0x28   :  { %p244_p2 = scmp.ne.s32.totalorder %s407_s2, %s243_s11  ;;  %p247_p3 = scmp.lt.u32.totalorder %s243_s11, %s407_s2 }
  0x29   :  { %v42_v14 = vadd.s32 128, %v41_v11  ;;  %vm73_vm0 = vcmp.lt.s32.totalorder %v41_v11, 112  ;;  %vm57_vm1 = vcmp.lt.s32.totalorder %v41_v11, 16  ;;  %v43_v17 = vand.u32 15, %v41_v11 }
  0x2a   :  { %80 = vrot.lane.b32.xlu1 %v309_v1, %s261_s4  ;;  %71 = vrot.lane.b32.xlu0 %v309_v1, %s262_s5  ;;  %vm127_vm3 = vcmp.lt.s32.totalorder %v41_v11, 1  ;;  %vm118_vm4 = vcmp.lt.s32.totalorder %v41_v11, 127  ;;  %p249_p4 = pnand %p247_p3, %p244_p2 }
  0x2b   :  { %vm64_vm2 = vcmp.ge.s32.totalorder %v42_v14, 240  ;;  %v44_v22 = vand.u32 15, %v42_v14  ;;  %vm337_vm5 = vcmp.eq.s32.totalorder %v43_v17, 15  ;;  %vm343_vm6 = vcmp.eq.s32.totalorder %v43_v17, 0 }
  0x2d   :  { %vm347_vm7 = vcmp.eq.s32.totalorder %v44_v22, 0  ;;  %vm360_vm8 = vcmp.eq.s32.totalorder %v44_v22, 15 }
  0x2e   :  { %92 = vrot.lane.b32.xlu1 %v313_v2, %s262_s5  ;;  %90 = vrot.lane.b32.xlu0 %v315_v3, %s262_s5 }
  0x32   :  { %100 = vrot.lane.b32.xlu1 %v313_v2, %s261_s4  ;;  %98 = vrot.lane.b32.xlu0 %v315_v3, %s261_s4 }
  0x36   :  { %116 = vrot.lane.b32.xlu1 %v309_v1, %s263_s1  ;;  %114 = vrot.lane.b32.xlu0 %v305_v0, %s263_s1 }
  0x3a   :  { %125 = vrot.lane.b32.xlu1 %v309_v1, %s264_s6  ;;  %123 = vrot.lane.b32.xlu0 %v305_v0, %s264_s6 }
  0x3e   :  { %138 = vrot.lane.b32.xlu1 %v313_v2, %s263_s1  ;;  %136 = vrot.lane.b32.xlu0 %v315_v3, %s263_s1 }
  0x42   :  { %146 = vrot.lane.b32.xlu1 %v313_v2, %s264_s6  ;;  %144 = vrot.lane.b32.xlu0 %v315_v3, %s264_s6 }
  0x98   :  { %v79_v4 = vpop.permute.xlu1 %78  ;;  %v70_v5 = vpop.permute.xlu0 %69 }
  0x9c   :  { %v81_v6 = vpop.permute.xlu1 %80  ;;  %v72_v7 = vpop.permute.xlu0 %71 }
  0x9d   :  { %v75_v18 = vsel %vm73_vm0, %v72_v7, %v70_v5  ;;  %v83_v20 = vsel %vm57_vm1, %v81_v6, %v79_v4  ;;  %v82_v25 = vsel %vm57_vm1, %v79_v4, %v81_v6  ;;  %v74_v34 = vsel %vm73_vm0, %v70_v5, %v72_v7 }
  0x9e   :  { %v77_v26 = vsel %vm64_vm2, %v309_v1, %v75_v18  ;;  %v84_v33 = vsel %vm57_vm1, %v305_v0, %v83_v20 }
  0x9f   :  { %v87_v37 = vsub.f32 %v77_v26, %v82_v25  ;;  %v86_v48 = vsub.f32 %v74_v34, %v84_v33 }
  0xa0   :  { %v93_v9 = vpop.permute.xlu1 %92  ;;  %v91_v10 = vpop.permute.xlu0 %90 }
  0xa1   :  { %v95_v21 = vsel %vm73_vm0, %v93_v9, %v91_v10  ;;  %v94_v38 = vsel %vm73_vm0, %v91_v10, %v93_v9  ;;  %v89_v52 = vand.u32 2147483647, %v87_v37  ;;  %v88_v4 = vand.u32 2147483647, %v86_v48 }
  0xa2   :  { %v97_v35 = vsel %vm64_vm2, %v313_v2, %v95_v21 }
  0xa4   :  { %v101_v12 = vpop.permute.xlu1 %100  ;;  %v99_v13 = vpop.permute.xlu0 %98 }
  0xa5   :  { %v103_v19 = vsel %vm57_vm1, %v101_v12, %v99_v13  ;;  %v102_v27 = vsel %vm57_vm1, %v99_v13, %v101_v12 }
  0xa6   :  { %v104_v29 = vsel %vm57_vm1, %v315_v3, %v103_v19  ;;  %v107_v39 = vsub.f32 %v97_v35, %v102_v27 }
  0xa7   :  { %v106_v43 = vsub.f32 %v94_v38, %v104_v29 }
  0xa8   :  { %v117_v15 = vpop.permute.xlu1 %116  ;;  %v115_v16 = vpop.permute.xlu0 %114  ;;  %v109_v53 = vand.u32 2147483647, %v107_v39 }
  0xa9   :  { %v119_v40 = vsel %vm118_vm4, %v115_v16, %v117_v15  ;;  %v120_v45 = vsel %vm118_vm4, %v117_v15, %v115_v16  ;;  %v108_v58 = vand.u32 2147483647, %v106_v43 }
  0xaa   :  { %v121_v49 = vsel %vm337_vm5, %v305_v0, %v119_v40  ;;  %v122_v54 = vsel %vm360_vm8, %v309_v1, %v120_v45  ;;  %v111_v7 = vsub.f32 %v89_v52, %v109_v53 }
  0xab   :  { %v110_v12 = vsub.f32 %v88_v4, %v108_v58 }
  0xac   :  { %v126_v23 = vpop.permute.xlu1 %125  ;;  %v124_v24 = vpop.permute.xlu0 %123  ;;  %v113_v15 = vand.u32 2147483647, %v111_v7 }
  0xad   :  { %v129_v32 = vsel %vm127_vm3, %v126_v23, %v124_v24  ;;  %v128_v36 = vsel %vm127_vm3, %v124_v24, %v126_v23  ;;  %v112_v16 = vand.u32 2147483647, %v110_v12 }
  0xae   :  { %v130_v46 = vsel %vm343_vm6, %v305_v0, %v129_v32  ;;  %v131_v47 = vsel %vm347_vm7, %v309_v1, %v128_v36 }
  0xaf   :  { %v132_v55 = vsub.f32 %v121_v49, %v130_v46  ;;  %v133_v59 = vsub.f32 %v122_v54, %v131_v47 }
  0xb0   :  { %v139_v41 = vpop.permute.xlu1 %138  ;;  %v137_v42 = vpop.permute.xlu0 %136 }
  0xb1   :  { %v140_v50 = vsel %vm118_vm4, %v137_v42, %v139_v41  ;;  %v141_v51 = vsel %vm118_vm4, %v139_v41, %v137_v42  ;;  %v134_v8 = vand.u32 2147483647, %v132_v55  ;;  %v135_v9 = vand.u32 2147483647, %v133_v59 }
  0xb2   :  { %v142_v62 = vsel %vm337_vm5, %v315_v3, %v140_v50  ;;  %v143_v63 = vsel %vm360_vm8, %v313_v2, %v141_v51 }
  0xb4   :  { %v147_v56 = vpop.permute.xlu1 %146  ;;  %v145_v57 = vpop.permute.xlu0 %144 }
  0xb5   :  { %v148_v60 = vsel %vm127_vm3, %v145_v57, %v147_v56  ;;  %v149_v61 = vsel %vm127_vm3, %v147_v56, %v145_v57 }
  0xb6   :  { %v150_v0 = vsel %vm343_vm6, %v315_v3, %v149_v61  ;;  %v151_v1 = vsel %vm347_vm7, %v313_v2, %v148_v60 }
  0xb7   :  { %v152_v5 = vsub.f32 %v142_v62, %v150_v0  ;;  %v153_v6 = vsub.f32 %v143_v63, %v151_v1 }
  0xb9   :  { %v154_v10 = vand.u32 2147483647, %v152_v5  ;;  %v155_v11 = vand.u32 2147483647, %v153_v6 }
  0xbb   :  { %v156_v13 = vsub.f32 %v134_v8, %v154_v10  ;;  %v157_v14 = vsub.f32 %v135_v9, %v155_v11 }
  0xbd   :  { %v158_v17 = vand.u32 2147483647, %v156_v13  ;;  %v159_v18 = vand.u32 2147483647, %v157_v14 }
  0xbf   :  { %v160_v3 = vadd.f32 %v158_v17, %v112_v16  ;;  %v161_v19 = vadd.f32 %v159_v18, %v113_v15 }
  0xc1   :  { %v162_v20 = vadd.f32 %v161_v19, %v160_v3 }
  0xc3   :  { %163 = vadd.xlane.f32.xlu0 %v162_v20 }
 0x150   :  { %v164_v2 = vpop.xlane.xlu0 %163 }
 0x151   :  { %v165_v21 = vrot.slane %v164_v2, 4 }
 0x153   :  { %v166_v22 = vadd.f32 %v165_v21, %v164_v2 }
 0x155   :  { %v167_v23 = vrot.slane %v166_v22, 2 }
 0x157   :  { %v168_v24 = vadd.f32 %v167_v23, %v166_v22 }
 0x159   :  { %v169_v25 = vrot.slane %v168_v24, 1 }
 0x15b   :  { %v170_v26 = vadd.f32 %v169_v25, %v168_v24 }
 0x15d   :  { %190 = vpush %v170_v26 }
 0x18e   :  { %s191_s7 = spop %190 }
 0x18f   :  { %s172_s8 = smul.f32 0.5, %s191_s7 }
 0x191   :  { %174 = sst [smem:[#allocation7]] %s172_s8 }
 0x192   :  { %252 = shalt.err (!%p249_p4)
}
 0x193   :  { %s265_s16 = smov [#allocation7]  }
 0x194   :  { %182 = dma.smem_to_hbm %s265_s16, 16, %s407_s2, [#allocation4]  }
 0x195   :  { %257 = dma.done.wait [#allocation4], 16  }
 0x196   :  { %258 = vsyncadd [#allocation4], 4294967280 }
 0x197   :  { %186 = sfence }
 0x198   :  { %187 = vsyncpa [#allocation3], 1 }
 0x199   :  { %188 = vsyncpa [#allocation6], 1 }
 0x19a   :  { %189 = vsyncpa [#allocation4], 1 }

</bundles_post_ra>
